<compile_context>
chip_gen: v6e
topology: v6e:2x2x1
jax: 0.10.0
libtpu: 0.0.40
codegen_flags: <defaults>
</compile_context>

<pallas_src>
import jax
import jax.numpy as jnp
from jax import lax
from jax.experimental import pallas as pl
from jax.experimental.pallas import tpu as pltpu

_SUB = 8  # sublane granularity: rows are gathered/stored in groups of 8


def _round_up(a, b):
    return (a + b - 1) // b * b


def _vmem_capacity_bytes():
    try:
        return int(pltpu.get_tpu_info().vmem_capacity_bytes)
    except Exception:
        return 64 << 20  # conservative default: v7x per-TensorCore VMEM


# ----------------------------------------------------------------------------
# Fast path: whole embedding table resident in VMEM (loaded once at step 0).
# ----------------------------------------------------------------------------
def _embedding_resident_kernel(idx_ref, w_hbm, out_ref, w_vmem, copy_sem):
    # idx_ref : SMEM (Np,) int32            -- scalar-prefetched flat indices
    # w_hbm   : HBM  (V, D) float32         -- embedding table (untiled)
    # out_ref : VMEM (tm, D) float32        -- output tile for this grid step
    # w_vmem  : VMEM (V, D) float32 scratch -- single-buffered resident table
    i = pl.program_id(0)
    tm = out_ref.shape[0]
    v = w_vmem.shape[0]

    # Load the table into VMEM exactly once. Grid axis is "arbitrary"
    # (sequential on one core) and scratch persists across grid steps.
    # TODO(synk): overlap this bulk V*D copy with the first output tile
    # (chunked copy + per-row HBM DMAs) to hide its latency when N is small.
    @pl.when(i == 0)
    def _():
        cp = pltpu.make_async_copy(w_hbm, w_vmem, copy_sem)
        cp.start()
        cp.wait()

    base = i * tm
    n_groups = tm // _SUB
    unroll = n_groups if n_groups <= 8 else 8

    def body(g, carry):
        r0 = pl.multiple_of(g * _SUB, _SUB)
        rows = []
        for s in range(_SUB):
            row = idx_ref[base + r0 + s]
            valid = jnp.logical_and(row >= 0, row < v)
            safe = jnp.where(valid, row, 0)
            gathered = w_vmem[pl.ds(safe, 1), :]          # (1, D) row gather
            # one_hot @ W yields an all-zero row for invalid indices; match it.
            rows.append(jnp.where(valid, gathered, 0.0))
        # One full 8-sublane slab store instead of 8 masked single-row stores.
        out_ref[pl.ds(r0, _SUB), :] = jnp.concatenate(rows, axis=0)
        return carry

    lax.fori_loop(0, n_groups, body, 0, unroll=unroll)


# ----------------------------------------------------------------------------
# Fallback: table streamed through VMEM in (tv, D) chunks (big vocab / v7x).
# ----------------------------------------------------------------------------
def _embedding_chunked_kernel(idx_ref, w_chunk_ref, out_ref):
    # idx_ref     : SMEM (Np,) int32   -- scalar-prefetched flat indices
    # w_chunk_ref : VMEM (tv, D)       -- pipelined table chunk j
    # out_ref     : VMEM (tm, D)       -- output tile i, resident across j
    i = pl.program_id(0)
    j = pl.program_id(1)
    tm = out_ref.shape[0]
    tv = w_chunk_ref.shape[0]
    base = i * tm
    chunk_lo = j * tv

    @pl.when(j == 0)
    def _():
        out_ref[...] = jnp.zeros_like(out_ref)

    n_groups = tm // _SUB
    unroll = n_groups if n_groups <= 8 else 8

    def body(g, carry):
        r0 = pl.multiple_of(g * _SUB, _SUB)
        rows = []
        for s in range(_SUB):
            row = idx_ref[base + r0 + s]
            local = row - chunk_lo
            in_chunk = jnp.logical_and(local >= 0, local < tv)
            safe = jnp.where(in_chunk, local, 0)
            gathered = w_chunk_ref[pl.ds(safe, 1), :]     # (1, D) row gather
            rows.append(jnp.where(in_chunk, gathered, 0.0))
        # Each row belongs to exactly one chunk; accumulate the contribution
        # slab with a single 8-sublane read-modify-write.
        out_ref[pl.ds(r0, _SUB), :] += jnp.concatenate(rows, axis=0)
        return carry

    lax.fori_loop(0, n_groups, body, 0, unroll=unroll)


def embedding_forward(x, weight, *, tm=None, tv=None, force_chunked=False,
                      vmem_budget_bytes=None):
    """x: int array (...,); weight: (V, D) float32 -> float32 (..., D)."""
    orig_shape = tuple(x.shape)
    V, D = weight.shape
    N = 1
    for dsz in orig_shape:
        N *= int(dsz)
    weight = weight.astype(jnp.float32)

    capacity = _vmem_capacity_bytes()
    budget = (vmem_budget_bytes if vmem_budget_bytes is not None
              else max(capacity - (8 << 20), 16 << 20))

    # Padded per-row VMEM footprint (lanes pad to 128, sublanes to 8).
    lane_d = _round_up(D, 128)
    row_bytes = lane_d * 4
    table_rows = _round_up(V, _SUB)
    table_bytes = table_rows * row_bytes
    headroom = 2 << 20

    # Output tile: big tiles amortize the ~0.35 us/step pipeline overhead, but
    # never bigger than the (padded) token count.
    if tm is None:
        tm = 1024 if row_bytes <= 2048 else 512
    tm = max(_SUB, min(_round_up(tm, _SUB), _round_up(max(N, 1), _SUB)))

    def resident_need(tm_):
        # resident table + double-buffered (tm, D) output tiles + slack
        return table_bytes + 2 * tm_ * row_bytes + headroom

    # Decide residency: shrink tm first, only fall back to chunked streaming
    # if even tm = 8 next to the table does not fit the VMEM budget.
    use_resident = not force_chunked
    if use_resident and resident_need(tm) > budget:
        tm_max = (budget - table_bytes - headroom) // (2 * row_bytes)
        tm_max = (tm_max // _SUB) * _SUB
        if tm_max >= _SUB:
            tm = min(tm, tm_max)
        else:
            use_resident = False

    n_tiles = pl.cdiv(N, tm)
    Np = n_tiles * tm

    # Flat, padded indices live in SMEM via scalar prefetch; padded slots
    # gather row 0 and are sliced away.
    # TODO(synk): for very large N (>~256K tokens) the 1-D SMEM array pads to
    # next_pow2(4*Np) bytes; switch to per-tile SMEM index blocks there.
    idx_flat = jnp.zeros((Np,), dtype=jnp.int32).at[:N].set(
        x.reshape(N).astype(jnp.int32))

    if use_resident:
        vmem_limit = int(min(max(resident_need(tm) + (2 << 20), 16 << 20),
                             capacity))
        out_flat = pl.pallas_call(
            _embedding_resident_kernel,
            out_shape=jax.ShapeDtypeStruct((Np, D), jnp.float32),
            grid_spec=pltpu.PrefetchScalarGridSpec(
                num_scalar_prefetch=1,
                grid=(n_tiles,),
                in_specs=[
                    pl.BlockSpec(memory_space=pl.ANY),    # table stays in HBM
                ],
                out_specs=pl.BlockSpec((tm, D), lambda i, idx: (i, 0)),
                scratch_shapes=[
                    pltpu.VMEM((V, D), jnp.float32),      # resident table
                    pltpu.SemaphoreType.DMA(()),
                ],
            ),
            compiler_params=pltpu.CompilerParams(
                # Must stay "arbitrary": the table is loaded at step 0 and the
                # scratch must persist sequentially across steps.
                # TODO(synk): on v7x, split the grid across the 2 TensorCores
                # with a per-core table copy for ~2x gather/store bandwidth.
                dimension_semantics=("arbitrary",),
                vmem_limit_bytes=vmem_limit,
            ),
        )(idx_flat, weight)
    else:
        # V-chunked fallback: table streamed through VMEM in (tv, D) blocks,
        # double-buffered by the BlockSpec pipeline; works for tables that do
        # not fit next to the output tiles (e.g. v7x's 64 MiB per TC).
        if tv is None:
            avail = budget - 2 * tm * row_bytes - headroom
            tv = max(_SUB, min(table_rows,
                               (avail // (2 * row_bytes)) // _SUB * _SUB))
        tv = max(_SUB, _round_up(int(tv), _SUB))
        n_vchunks = pl.cdiv(V, tv)
        Vp = n_vchunks * tv
        w_padded = jnp.zeros((Vp, D), jnp.float32).at[:V].set(weight)

        vmem_limit = int(min(max(2 * tv * row_bytes + 2 * tm * row_bytes
                                 + (4 << 20), 16 << 20), capacity))
        out_flat = pl.pallas_call(
            _embedding_chunked_kernel,
            out_shape=jax.ShapeDtypeStruct((Np, D), jnp.float32),
            grid_spec=pltpu.PrefetchScalarGridSpec(
                num_scalar_prefetch=1,
                grid=(n_tiles, n_vchunks),
                in_specs=[
                    pl.BlockSpec((tv, D), lambda i, j, idx: (j, 0)),
                ],
                out_specs=pl.BlockSpec((tm, D), lambda i, j, idx: (i, 0)),
            ),
            compiler_params=pltpu.CompilerParams(
                # Output tiles are independent -> outer axis parallel (uses
                # both TensorCores on v7x); chunk axis is the reduction.
                dimension_semantics=("parallel", "arbitrary"),
                vmem_limit_bytes=vmem_limit,
            ),
        )(idx_flat, w_padded)

    # TODO(synk): D < 128 (e.g. the D=32 test) still means masked partial-lane
    # stores / padded writeback on the output; packing 128/D tokens per lane
    # row would make the out_spec lane-dense.
    return out_flat[:N].reshape(*orig_shape, D)


if __name__ == "__main__":
    key = jax.random.PRNGKey(0)
    k1, k2, k3, k4 = jax.random.split(key, 4)

    # --- Test 1: spec-consistent small shapes (resident-table fast path) ---
    B, S = 2, 8          # batch, sequence length
    V, D = 16, 32        # num classes (self.num), embedding dim
    weight = jax.random.normal(k1, (V, D), dtype=jnp.float32)
    x = jax.random.randint(k2, (B, S), 0, V, dtype=jnp.int32)

    out = embedding_forward(x, weight)
    jax.block_until_ready(out)
    ref = jnp.einsum("bsv,vd->bsd",
                     jax.nn.one_hot(x, V, dtype=jnp.float32), weight)
    assert out.shape == (B, S, D)
    assert jnp.allclose(out, ref, atol=1e-6), "resident path mismatch"

    # --- Test 2: exercise the V-chunked fallback (table streamed in chunks) ---
    B2, S2 = 4, 16
    V2, D2 = 300, 128
    weight2 = jax.random.normal(k3, (V2, D2), dtype=jnp.float32)
    x2 = jax.random.randint(k4, (B2, S2), 0, V2, dtype=jnp.int32)

    out2 = embedding_forward(x2, weight2, force_chunked=True, tm=64, tv=128)
    jax.block_until_ready(out2)
    ref2 = jnp.einsum("bsv,vd->bsd",
                      jax.nn.one_hot(x2, V2, dtype=jnp.float32), weight2)
    assert out2.shape == (B2, S2, D2)
    assert jnp.allclose(out2, ref2, atol=1e-6), "chunked path mismatch"

    print("KERNEL_OK")
</pallas_src>

<mosaic_0001>
module attributes {stable_mosaic.version = 11 : i64} {
  func.func @_embedding_resident_kernel(%arg0: i32, %arg1: memref<16xi32, #tpu.memory_space<smem>>, %arg2: memref<16x32xf32, #tpu.memory_space<any>>, %arg3: memref<16x32xf32, #tpu.memory_space<vmem>>, %arg4: memref<16x32xf32, #tpu.memory_space<vmem>>, %arg5: memref<!tpu.dma_semaphore, #tpu.memory_space<semaphore_mem>>) attributes {dimension_semantics = [#tpu.dimension_semantics<arbitrary>], iteration_bounds = array<i64: 1>, scalar_prefetch = 1 : i64, scratch_operands = 2 : i64, tpu.core_type = #tpu.core_type<tc>, window_params = [{}, {transform_indices = @transform_1, window_bounds = array<i64: 16, 32>}]} {
    %c0_i32 = arith.constant 0 : i32
    %0 = arith.cmpi eq, %arg0, %c0_i32 : i32
    %1 = arith.extui %0 : i1 to i32
    %c0_i32_0 = arith.constant 0 : i32
    %2 = arith.cmpi ne, %1, %c0_i32_0 : i32
    scf.if %2 {
      tpu.enqueue_dma source(%arg2 : memref<16x32xf32, #tpu.memory_space<any>>) target(%arg4 : memref<16x32xf32, #tpu.memory_space<vmem>>) target_semaphore(%arg5 : memref<!tpu.dma_semaphore, #tpu.memory_space<semaphore_mem>>)
      tpu.wait_dma2 semaphore(%arg5 : memref<!tpu.dma_semaphore, #tpu.memory_space<semaphore_mem>>) src(%arg2 : memref<16x32xf32, #tpu.memory_space<any>>) dst(%arg4 : memref<16x32xf32, #tpu.memory_space<vmem>>)
    } else {
    }
    %c16_i32 = arith.constant 16 : i32
    %3 = arith.muli %arg0, %c16_i32 : i32
    %c0_i32_1 = arith.constant 0 : i32
    %c8_i32 = arith.constant 8 : i32
    %4 = arith.muli %c0_i32_1, %c8_i32 : i32
    %5 = tpu.assume_multiple %4, 8 : i32
    %6 = arith.addi %3, %5 : i32
    %c0_i32_2 = arith.constant 0 : i32
    %7 = arith.addi %6, %c0_i32_2 : i32
    %8 = arith.index_cast %7 : i32 to index
    %9 = memref.load %arg1[%8] : memref<16xi32, #tpu.memory_space<smem>>
    %c0_i32_3 = arith.constant 0 : i32
    %10 = arith.cmpi sge, %9, %c0_i32_3 : i32
    %c16_i32_4 = arith.constant 16 : i32
    %11 = arith.cmpi slt, %9, %c16_i32_4 : i32
    %12 = arith.andi %10, %11 : i1
    %c0_i32_5 = arith.constant 0 : i32
    %13 = arith.select %12, %9, %c0_i32_5 : i32
    %14 = arith.index_cast %13 : i32 to index
    %c0 = arith.constant 0 : index
    %15 = vector.load %arg4[%14, %c0] : memref<16x32xf32, #tpu.memory_space<vmem>>, vector<1x32xf32>
    %cst = arith.constant 0.000000e+00 : f32
    %16 = vector.broadcast %cst : f32 to vector<1x32xf32>
    %17 = arith.select %12, %15, %16 : vector<1x32xf32>
    %18 = arith.addi %3, %5 : i32
    %c1_i32 = arith.constant 1 : i32
    %19 = arith.addi %18, %c1_i32 : i32
    %20 = arith.index_cast %19 : i32 to index
    %21 = memref.load %arg1[%20] : memref<16xi32, #tpu.memory_space<smem>>
    %c0_i32_6 = arith.constant 0 : i32
    %22 = arith.cmpi sge, %21, %c0_i32_6 : i32
    %c16_i32_7 = arith.constant 16 : i32
    %23 = arith.cmpi slt, %21, %c16_i32_7 : i32
    %24 = arith.andi %22, %23 : i1
    %c0_i32_8 = arith.constant 0 : i32
    %25 = arith.select %24, %21, %c0_i32_8 : i32
    %26 = arith.index_cast %25 : i32 to index
    %c0_9 = arith.constant 0 : index
    %27 = vector.load %arg4[%26, %c0_9] : memref<16x32xf32, #tpu.memory_space<vmem>>, vector<1x32xf32>
    %cst_10 = arith.constant 0.000000e+00 : f32
    %28 = vector.broadcast %cst_10 : f32 to vector<1x32xf32>
    %29 = arith.select %24, %27, %28 : vector<1x32xf32>
    %30 = arith.addi %3, %5 : i32
    %c2_i32 = arith.constant 2 : i32
    %31 = arith.addi %30, %c2_i32 : i32
    %32 = arith.index_cast %31 : i32 to index
    %33 = memref.load %arg1[%32] : memref<16xi32, #tpu.memory_space<smem>>
    %c0_i32_11 = arith.constant 0 : i32
    %34 = arith.cmpi sge, %33, %c0_i32_11 : i32
    %c16_i32_12 = arith.constant 16 : i32
    %35 = arith.cmpi slt, %33, %c16_i32_12 : i32
    %36 = arith.andi %34, %35 : i1
    %c0_i32_13 = arith.constant 0 : i32
    %37 = arith.select %36, %33, %c0_i32_13 : i32
    %38 = arith.index_cast %37 : i32 to index
    %c0_14 = arith.constant 0 : index
    %39 = vector.load %arg4[%38, %c0_14] : memref<16x32xf32, #tpu.memory_space<vmem>>, vector<1x32xf32>
    %cst_15 = arith.constant 0.000000e+00 : f32
    %40 = vector.broadcast %cst_15 : f32 to vector<1x32xf32>
    %41 = arith.select %36, %39, %40 : vector<1x32xf32>
    %42 = arith.addi %3, %5 : i32
    %c3_i32 = arith.constant 3 : i32
    %43 = arith.addi %42, %c3_i32 : i32
    %44 = arith.index_cast %43 : i32 to index
    %45 = memref.load %arg1[%44] : memref<16xi32, #tpu.memory_space<smem>>
    %c0_i32_16 = arith.constant 0 : i32
    %46 = arith.cmpi sge, %45, %c0_i32_16 : i32
    %c16_i32_17 = arith.constant 16 : i32
    %47 = arith.cmpi slt, %45, %c16_i32_17 : i32
    %48 = arith.andi %46, %47 : i1
    %c0_i32_18 = arith.constant 0 : i32
    %49 = arith.select %48, %45, %c0_i32_18 : i32
    %50 = arith.index_cast %49 : i32 to index
    %c0_19 = arith.constant 0 : index
    %51 = vector.load %arg4[%50, %c0_19] : memref<16x32xf32, #tpu.memory_space<vmem>>, vector<1x32xf32>
    %cst_20 = arith.constant 0.000000e+00 : f32
    %52 = vector.broadcast %cst_20 : f32 to vector<1x32xf32>
    %53 = arith.select %48, %51, %52 : vector<1x32xf32>
    %54 = arith.addi %3, %5 : i32
    %c4_i32 = arith.constant 4 : i32
    %55 = arith.addi %54, %c4_i32 : i32
    %56 = arith.index_cast %55 : i32 to index
    %57 = memref.load %arg1[%56] : memref<16xi32, #tpu.memory_space<smem>>
    %c0_i32_21 = arith.constant 0 : i32
    %58 = arith.cmpi sge, %57, %c0_i32_21 : i32
    %c16_i32_22 = arith.constant 16 : i32
    %59 = arith.cmpi slt, %57, %c16_i32_22 : i32
    %60 = arith.andi %58, %59 : i1
    %c0_i32_23 = arith.constant 0 : i32
    %61 = arith.select %60, %57, %c0_i32_23 : i32
    %62 = arith.index_cast %61 : i32 to index
    %c0_24 = arith.constant 0 : index
    %63 = vector.load %arg4[%62, %c0_24] : memref<16x32xf32, #tpu.memory_space<vmem>>, vector<1x32xf32>
    %cst_25 = arith.constant 0.000000e+00 : f32
    %64 = vector.broadcast %cst_25 : f32 to vector<1x32xf32>
    %65 = arith.select %60, %63, %64 : vector<1x32xf32>
    %66 = arith.addi %3, %5 : i32
    %c5_i32 = arith.constant 5 : i32
    %67 = arith.addi %66, %c5_i32 : i32
    %68 = arith.index_cast %67 : i32 to index
    %69 = memref.load %arg1[%68] : memref<16xi32, #tpu.memory_space<smem>>
    %c0_i32_26 = arith.constant 0 : i32
    %70 = arith.cmpi sge, %69, %c0_i32_26 : i32
    %c16_i32_27 = arith.constant 16 : i32
    %71 = arith.cmpi slt, %69, %c16_i32_27 : i32
    %72 = arith.andi %70, %71 : i1
    %c0_i32_28 = arith.constant 0 : i32
    %73 = arith.select %72, %69, %c0_i32_28 : i32
    %74 = arith.index_cast %73 : i32 to index
    %c0_29 = arith.constant 0 : index
    %75 = vector.load %arg4[%74, %c0_29] : memref<16x32xf32, #tpu.memory_space<vmem>>, vector<1x32xf32>
    %cst_30 = arith.constant 0.000000e+00 : f32
    %76 = vector.broadcast %cst_30 : f32 to vector<1x32xf32>
    %77 = arith.select %72, %75, %76 : vector<1x32xf32>
    %78 = arith.addi %3, %5 : i32
    %c6_i32 = arith.constant 6 : i32
    %79 = arith.addi %78, %c6_i32 : i32
    %80 = arith.index_cast %79 : i32 to index
    %81 = memref.load %arg1[%80] : memref<16xi32, #tpu.memory_space<smem>>
    %c0_i32_31 = arith.constant 0 : i32
    %82 = arith.cmpi sge, %81, %c0_i32_31 : i32
    %c16_i32_32 = arith.constant 16 : i32
    %83 = arith.cmpi slt, %81, %c16_i32_32 : i32
    %84 = arith.andi %82, %83 : i1
    %c0_i32_33 = arith.constant 0 : i32
    %85 = arith.select %84, %81, %c0_i32_33 : i32
    %86 = arith.index_cast %85 : i32 to index
    %c0_34 = arith.constant 0 : index
    %87 = vector.load %arg4[%86, %c0_34] : memref<16x32xf32, #tpu.memory_space<vmem>>, vector<1x32xf32>
    %cst_35 = arith.constant 0.000000e+00 : f32
    %88 = vector.broadcast %cst_35 : f32 to vector<1x32xf32>
    %89 = arith.select %84, %87, %88 : vector<1x32xf32>
    %90 = arith.addi %3, %5 : i32
    %c7_i32 = arith.constant 7 : i32
    %91 = arith.addi %90, %c7_i32 : i32
    %92 = arith.index_cast %91 : i32 to index
    %93 = memref.load %arg1[%92] : memref<16xi32, #tpu.memory_space<smem>>
    %c0_i32_36 = arith.constant 0 : i32
    %94 = arith.cmpi sge, %93, %c0_i32_36 : i32
    %c16_i32_37 = arith.constant 16 : i32
    %95 = arith.cmpi slt, %93, %c16_i32_37 : i32
    %96 = arith.andi %94, %95 : i1
    %c0_i32_38 = arith.constant 0 : i32
    %97 = arith.select %96, %93, %c0_i32_38 : i32
    %98 = arith.index_cast %97 : i32 to index
    %c0_39 = arith.constant 0 : index
    %99 = vector.load %arg4[%98, %c0_39] : memref<16x32xf32, #tpu.memory_space<vmem>>, vector<1x32xf32>
    %cst_40 = arith.constant 0.000000e+00 : f32
    %100 = vector.broadcast %cst_40 : f32 to vector<1x32xf32>
    %101 = arith.select %96, %99, %100 : vector<1x32xf32>
    %102 = tpu.concatenate %17, %29, %41, %53, %65, %77, %89, %101 in 0 : vector<1x32xf32>, vector<1x32xf32>, vector<1x32xf32>, vector<1x32xf32>, vector<1x32xf32>, vector<1x32xf32>, vector<1x32xf32>, vector<1x32xf32> -> vector<8x32xf32>
    %103 = arith.index_cast %5 : i32 to index
    %c0_41 = arith.constant 0 : index
    %104 = vector.load %arg3[%103, %c0_41] : memref<16x32xf32, #tpu.memory_space<vmem>>, vector<8x32xf32>
    tpu.vector_store %arg3[%103, %c0_41], %102 {strides = array<i32>} : memref<16x32xf32, #tpu.memory_space<vmem>>, vector<8x32xf32>,
    %c1_i32_42 = arith.constant 1 : i32
    %c8_i32_43 = arith.constant 8 : i32
    %105 = arith.muli %c1_i32_42, %c8_i32_43 : i32
    %106 = tpu.assume_multiple %105, 8 : i32
    %107 = arith.addi %3, %106 : i32
    %c0_i32_44 = arith.constant 0 : i32
    %108 = arith.addi %107, %c0_i32_44 : i32
    %109 = arith.index_cast %108 : i32 to index
    %110 = memref.load %arg1[%109] : memref<16xi32, #tpu.memory_space<smem>>
    %c0_i32_45 = arith.constant 0 : i32
    %111 = arith.cmpi sge, %110, %c0_i32_45 : i32
    %c16_i32_46 = arith.constant 16 : i32
    %112 = arith.cmpi slt, %110, %c16_i32_46 : i32
    %113 = arith.andi %111, %112 : i1
    %c0_i32_47 = arith.constant 0 : i32
    %114 = arith.select %113, %110, %c0_i32_47 : i32
    %115 = arith.index_cast %114 : i32 to index
    %c0_48 = arith.constant 0 : index
    %116 = vector.load %arg4[%115, %c0_48] : memref<16x32xf32, #tpu.memory_space<vmem>>, vector<1x32xf32>
    %cst_49 = arith.constant 0.000000e+00 : f32
    %117 = vector.broadcast %cst_49 : f32 to vector<1x32xf32>
    %118 = arith.select %113, %116, %117 : vector<1x32xf32>
    %119 = arith.addi %3, %106 : i32
    %c1_i32_50 = arith.constant 1 : i32
    %120 = arith.addi %119, %c1_i32_50 : i32
    %121 = arith.index_cast %120 : i32 to index
    %122 = memref.load %arg1[%121] : memref<16xi32, #tpu.memory_space<smem>>
    %c0_i32_51 = arith.constant 0 : i32
    %123 = arith.cmpi sge, %122, %c0_i32_51 : i32
    %c16_i32_52 = arith.constant 16 : i32
    %124 = arith.cmpi slt, %122, %c16_i32_52 : i32
    %125 = arith.andi %123, %124 : i1
    %c0_i32_53 = arith.constant 0 : i32
    %126 = arith.select %125, %122, %c0_i32_53 : i32
    %127 = arith.index_cast %126 : i32 to index
    %c0_54 = arith.constant 0 : index
    %128 = vector.load %arg4[%127, %c0_54] : memref<16x32xf32, #tpu.memory_space<vmem>>, vector<1x32xf32>
    %cst_55 = arith.constant 0.000000e+00 : f32
    %129 = vector.broadcast %cst_55 : f32 to vector<1x32xf32>
    %130 = arith.select %125, %128, %129 : vector<1x32xf32>
    %131 = arith.addi %3, %106 : i32
    %c2_i32_56 = arith.constant 2 : i32
    %132 = arith.addi %131, %c2_i32_56 : i32
    %133 = arith.index_cast %132 : i32 to index
    %134 = memref.load %arg1[%133] : memref<16xi32, #tpu.memory_space<smem>>
    %c0_i32_57 = arith.constant 0 : i32
    %135 = arith.cmpi sge, %134, %c0_i32_57 : i32
    %c16_i32_58 = arith.constant 16 : i32
    %136 = arith.cmpi slt, %134, %c16_i32_58 : i32
    %137 = arith.andi %135, %136 : i1
    %c0_i32_59 = arith.constant 0 : i32
    %138 = arith.select %137, %134, %c0_i32_59 : i32
    %139 = arith.index_cast %138 : i32 to index
    %c0_60 = arith.constant 0 : index
    %140 = vector.load %arg4[%139, %c0_60] : memref<16x32xf32, #tpu.memory_space<vmem>>, vector<1x32xf32>
    %cst_61 = arith.constant 0.000000e+00 : f32
    %141 = vector.broadcast %cst_61 : f32 to vector<1x32xf32>
    %142 = arith.select %137, %140, %141 : vector<1x32xf32>
    %143 = arith.addi %3, %106 : i32
    %c3_i32_62 = arith.constant 3 : i32
    %144 = arith.addi %143, %c3_i32_62 : i32
    %145 = arith.index_cast %144 : i32 to index
    %146 = memref.load %arg1[%145] : memref<16xi32, #tpu.memory_space<smem>>
    %c0_i32_63 = arith.constant 0 : i32
    %147 = arith.cmpi sge, %146, %c0_i32_63 : i32
    %c16_i32_64 = arith.constant 16 : i32
    %148 = arith.cmpi slt, %146, %c16_i32_64 : i32
    %149 = arith.andi %147, %148 : i1
    %c0_i32_65 = arith.constant 0 : i32
    %150 = arith.select %149, %146, %c0_i32_65 : i32
    %151 = arith.index_cast %150 : i32 to index
    %c0_66 = arith.constant 0 : index
    %152 = vector.load %arg4[%151, %c0_66] : memref<16x32xf32, #tpu.memory_space<vmem>>, vector<1x32xf32>
    %cst_67 = arith.constant 0.000000e+00 : f32
    %153 = vector.broadcast %cst_67 : f32 to vector<1x32xf32>
    %154 = arith.select %149, %152, %153 : vector<1x32xf32>
    %155 = arith.addi %3, %106 : i32
    %c4_i32_68 = arith.constant 4 : i32
    %156 = arith.addi %155, %c4_i32_68 : i32
    %157 = arith.index_cast %156 : i32 to index
    %158 = memref.load %arg1[%157] : memref<16xi32, #tpu.memory_space<smem>>
    %c0_i32_69 = arith.constant 0 : i32
    %159 = arith.cmpi sge, %158, %c0_i32_69 : i32
    %c16_i32_70 = arith.constant 16 : i32
    %160 = arith.cmpi slt, %158, %c16_i32_70 : i32
    %161 = arith.andi %159, %160 : i1
    %c0_i32_71 = arith.constant 0 : i32
    %162 = arith.select %161, %158, %c0_i32_71 : i32
    %163 = arith.index_cast %162 : i32 to index
    %c0_72 = arith.constant 0 : index
    %164 = vector.load %arg4[%163, %c0_72] : memref<16x32xf32, #tpu.memory_space<vmem>>, vector<1x32xf32>
    %cst_73 = arith.constant 0.000000e+00 : f32
    %165 = vector.broadcast %cst_73 : f32 to vector<1x32xf32>
    %166 = arith.select %161, %164, %165 : vector<1x32xf32>
    %167 = arith.addi %3, %106 : i32
    %c5_i32_74 = arith.constant 5 : i32
    %168 = arith.addi %167, %c5_i32_74 : i32
    %169 = arith.index_cast %168 : i32 to index
    %170 = memref.load %arg1[%169] : memref<16xi32, #tpu.memory_space<smem>>
    %c0_i32_75 = arith.constant 0 : i32
    %171 = arith.cmpi sge, %170, %c0_i32_75 : i32
    %c16_i32_76 = arith.constant 16 : i32
    %172 = arith.cmpi slt, %170, %c16_i32_76 : i32
    %173 = arith.andi %171, %172 : i1
    %c0_i32_77 = arith.constant 0 : i32
    %174 = arith.select %173, %170, %c0_i32_77 : i32
    %175 = arith.index_cast %174 : i32 to index
    %c0_78 = arith.constant 0 : index
    %176 = vector.load %arg4[%175, %c0_78] : memref<16x32xf32, #tpu.memory_space<vmem>>, vector<1x32xf32>
    %cst_79 = arith.constant 0.000000e+00 : f32
    %177 = vector.broadcast %cst_79 : f32 to vector<1x32xf32>
    %178 = arith.select %173, %176, %177 : vector<1x32xf32>
    %179 = arith.addi %3, %106 : i32
    %c6_i32_80 = arith.constant 6 : i32
    %180 = arith.addi %179, %c6_i32_80 : i32
    %181 = arith.index_cast %180 : i32 to index
    %182 = memref.load %arg1[%181] : memref<16xi32, #tpu.memory_space<smem>>
    %c0_i32_81 = arith.constant 0 : i32
    %183 = arith.cmpi sge, %182, %c0_i32_81 : i32
    %c16_i32_82 = arith.constant 16 : i32
    %184 = arith.cmpi slt, %182, %c16_i32_82 : i32
    %185 = arith.andi %183, %184 : i1
    %c0_i32_83 = arith.constant 0 : i32
    %186 = arith.select %185, %182, %c0_i32_83 : i32
    %187 = arith.index_cast %186 : i32 to index
    %c0_84 = arith.constant 0 : index
    %188 = vector.load %arg4[%187, %c0_84] : memref<16x32xf32, #tpu.memory_space<vmem>>, vector<1x32xf32>
    %cst_85 = arith.constant 0.000000e+00 : f32
    %189 = vector.broadcast %cst_85 : f32 to vector<1x32xf32>
    %190 = arith.select %185, %188, %189 : vector<1x32xf32>
    %191 = arith.addi %3, %106 : i32
    %c7_i32_86 = arith.constant 7 : i32
    %192 = arith.addi %191, %c7_i32_86 : i32
    %193 = arith.index_cast %192 : i32 to index
    %194 = memref.load %arg1[%193] : memref<16xi32, #tpu.memory_space<smem>>
    %c0_i32_87 = arith.constant 0 : i32
    %195 = arith.cmpi sge, %194, %c0_i32_87 : i32
    %c16_i32_88 = arith.constant 16 : i32
    %196 = arith.cmpi slt, %194, %c16_i32_88 : i32
    %197 = arith.andi %195, %196 : i1
    %c0_i32_89 = arith.constant 0 : i32
    %198 = arith.select %197, %194, %c0_i32_89 : i32
    %199 = arith.index_cast %198 : i32 to index
    %c0_90 = arith.constant 0 : index
    %200 = vector.load %arg4[%199, %c0_90] : memref<16x32xf32, #tpu.memory_space<vmem>>, vector<1x32xf32>
    %cst_91 = arith.constant 0.000000e+00 : f32
    %201 = vector.broadcast %cst_91 : f32 to vector<1x32xf32>
    %202 = arith.select %197, %200, %201 : vector<1x32xf32>
    %203 = tpu.concatenate %118, %130, %142, %154, %166, %178, %190, %202 in 0 : vector<1x32xf32>, vector<1x32xf32>, vector<1x32xf32>, vector<1x32xf32>, vector<1x32xf32>, vector<1x32xf32>, vector<1x32xf32>, vector<1x32xf32> -> vector<8x32xf32>
    %204 = arith.index_cast %106 : i32 to index
    %c0_92 = arith.constant 0 : index
    %205 = vector.load %arg3[%204, %c0_92] : memref<16x32xf32, #tpu.memory_space<vmem>>, vector<8x32xf32>
    tpu.vector_store %arg3[%204, %c0_92], %203 {strides = array<i32>} : memref<16x32xf32, #tpu.memory_space<vmem>>, vector<8x32xf32>,
    %c2_i32_93 = arith.constant 2 : i32
    return
  }
  func.func @transform_1(%arg0: i32, %arg1: memref<16xi32, #tpu.memory_space<smem>>) -> (i32, i32) {
    %c0_i32 = arith.constant 0 : i32
    %c0_i32_0 = arith.constant 0 : i32
    return %arg0, %c0_i32 : i32, i32
  }
}

</mosaic_0001>

<bundles_post_ra>
// kernel: tpu_custom_call.1
= control target key start
LH: loop header
LB: loop body
LE: loop exit
PB: predicated region body
PF: predicated region fallthrough
CT: control target
= control target key end

     0   :  { %s451_s9 = smov [#allocation5]   ;;  %s697_s0 = inlined_call_operand.hbm [shape: s32[16], index: 0, kind: input, shape index: {}]   ;;  %s698_s1 = inlined_call_operand.hbm [shape: f32[16,32], index: 1, kind: input, shape index: {}]   ;;  %s699_s2 = inlined_call_operand.hbm [shape: f32[16,32], index: 2, kind: output, shape index: {}]  }
   0x1   :  { %8 = dma.hbm_to_smem %s697_s0, 16, %s451_s9, [#allocation4] }
   0x2   :  { %445 = dma.done.wait [#allocation4], 16 }
   0x3   :  { %446 = vsyncadd [#allocation4], 4294967280 }
   0x4   :  { %10 = sfence }
   0x5   :  { %11 = vsyncpa [#allocation7], 0  ;;  %s452_s12 = smov [#allocation2]  }
   0x6   :  { %s23_s13 = sshll.u32 %s452_s12, 4  ;;  %s24_s13 = int_to_ptr.vmem [resolvable:$true] %s23_s13 }
   0x7   :  { %s413_s14 = scalar_lea.vmem %s24_s13, 256  ;;  %p418_p1 = scmp.lt.s32.totalorder %s24_s13, %s24_s13 }
   0x8   :  { %p414_p0 = scmp.ne.s32.totalorder %s24_s13, %s413_s14  ;;  %p419_p2 = scmp.lt.s32.totalorder %s413_s14, %s413_s14 }
   0xa   :  { %p420_p3 = por %p419_p2, %p418_p1 }
   0xc   :  { %p421_p4 = pnand %p420_p3, %p414_p0 }
   0xe   :  { %424 = shalt.err (!%p421_p4)  }
   0xf   :  { %26 = dma.hbm_to_vmem [thread:$0]  %s698_s1, 256, %s24_s13, [#allocation3] }
  0x10   :  { %447 = dma.done.wait [#allocation3], 256 }
  0x11   :  { %448 = vsyncadd [#allocation3], 4294967040  ;;  %s477_s0 = sld [smem:[#allocation5]]  ;;  %vm156_vm4 = vcmask 1040384   ;;  %vm158_vm6 = vcmask 1041408   ;;  %vm160_vm8 = vcmask 1042432  }
  0x12   :  { %s346_s17 = sld [smem:[#allocation5 + $0x1]]  ;;  %vm162_vm9 = vcmask 1043456   ;;  %vm164_vm10 = vcmask 1044480   ;;  %vm166_vm12 = vcmask 1045504   ;;  %vm168_vm14 = vcmask 1046528  }
  0x13   :  { %s479_s18 = sld [smem:[#allocation5 + $0x2]]  ;;  %vm170_vm15 = vcmask 261120  }
  0x14   :  { %s481_s19 = sld [smem:[#allocation5 + $0x3]] }
  0x15   :  { %s483_s20 = sld [smem:[#allocation5 + $0x4]] }
  0x16   :  { %s485_s21 = sld [smem:[#allocation5 + $0x5]] }
  0x17   :  { %p33_p5 = scmp.ge.s32.totalorder %s477_s0, 0  ;;  %p34_p6 = scmp.lt.s32.totalorder %s477_s0, 16 }
  0x18   :  { %p46_p7 = scmp.ge.s32.totalorder %s346_s17, 0  ;;  %p47_p8 = scmp.lt.s32.totalorder %s346_s17, 16 }
  0x19   :  { %p489_p9 = pnand %p34_p6, %p33_p5  ;;  %p59_p10 = scmp.ge.s32.totalorder %s479_s18, 0 }
  0x1a   :  { %p494_p11 = pnand %p47_p8, %p46_p7  ;;  %p60_p12 = scmp.lt.s32.totalorder %s479_s18, 16 }
  0x1b   :  { %s716_s0 = smov (%p489_p9, %s477_s0), 0  ;;  %p72_p0 = scmp.ge.s32.totalorder %s481_s19, 0 }
  0x1c   :  { %s345_s23 = scalar_select %p489_p9, 0, 1 }
  0x1d   :  { %p504_p13 = pnand %p60_p12, %p59_p10  ;;  %s718_s17 = smov (%p494_p11, %s346_s17), 0 }
  0x1e   :  { %s348_s25 = scalar_select %p494_p11, 0, 1  ;;  %v41_v3 = vstv %s345_s23 }
  0x1f   :  { %s720_s18 = smov (%p504_p13, %s479_s18), 0  ;;  %p73_p1 = scmp.lt.s32.totalorder %s481_s19, 16  ;;  %vm42_vm2 = vcmp.eq.s32.totalorder %v41_v3, 1 }
  0x20   :  { %s351_s26 = scalar_select %p504_p13, 0, 1  ;;  %v54_v0 = vstv %s348_s25 }
  0x21   :  { %p85_p2 = scmp.ge.s32.totalorder %s483_s20, 0  ;;  %p86_p3 = scmp.lt.s32.totalorder %s483_s20, 16  ;;  %vm55_vm0 = vcmp.eq.s32.totalorder %v54_v0, 1 }
  0x22   :  { %v67_v1 = vstv %s351_s26  ;;  %p521_p4 = pnand %p73_p1, %p72_p0  ;;  %p98_p5 = scmp.ge.s32.totalorder %s485_s21, 0 }
  0x23   :  { %s51_s28 = scalar_lea.vmem [#allocation2], %s718_s17  ;;  %p526_p6 = pnand %p86_p3, %p85_p2  ;;  %vm68_vm1 = vcmp.eq.s32.totalorder %v67_v1, 1 }
  0x24   :  { %v52_v2 = vld [vmem:[%s51_s28] sm:$0x1]  ;;  %p99_p7 = scmp.lt.s32.totalorder %s485_s21, 16  ;;  %s722_s19 = smov (%p521_p4, %s481_s19), 0 }
  0x25   :  { %s64_s30 = scalar_lea.vmem [#allocation2], %s720_s18  ;;  %v56_v5 = vsel %vm55_vm0, %v52_v2, 0.0  ;;  %s38_s5 = scalar_lea.vmem [#allocation2], %s716_s0 }
  0x26   :  { %v65_v4 = vld [vmem:[%s64_s30] sm:$0x1]  ;;  %s354_s3 = scalar_select %p521_p4, 0, 1  ;;  %v136_v10 = vrot.slane %v56_v5, 7 }
  0x27   :  { %p538_p8 = pnand %p99_p7, %p98_p5  ;;  %v39_v6 = vld [vmem:[%s38_s5] sm:$0x1]  ;;  %s724_s20 = smov (%p526_p6, %s483_s20), 0  ;;  %v69_v8 = vsel %vm68_vm1, %v65_v4, 0.0 }
  0x28   :  { %v80_v7 = vstv %s354_s3  ;;  %s77_s6 = scalar_lea.vmem [#allocation2], %s722_s19  ;;  %s547_s8 = sld [smem:[#allocation5 + $0x6]]  ;;  %v43_v11 = vsel %vm42_vm2, %v39_v6, 0.0  ;;  %v139_v14 = vrot.slane %v69_v8, 6 }
  0x29   :  { %v78_v9 = vld [vmem:[%s77_s6] sm:$0x1]  ;;  %vm81_vm3 = vcmp.eq.s32.totalorder %v80_v7, 1  ;;  %s357_s7 = scalar_select %p526_p6, 0, 1  ;;  %v157_v17 = vsel %vm156_vm4, %v43_v11, %v136_v10 }
  0x2a   :  { %s726_s21 = smov (%p538_p8, %s485_s21), 0  ;;  %v82_v13 = vsel %vm81_vm3, %v78_v9, 0.0  ;;  %s90_s10 = scalar_lea.vmem [#allocation2], %s724_s20  ;;  %v159_v21 = vsel %vm158_vm6, %v157_v17, %v139_v14 }
  0x2b   :  { %v93_v12 = vstv %s357_s7  ;;  %s360_s9 = scalar_select %p538_p8, 0, 1  ;;  %v91_v15 = vld [vmem:[%s90_s10] sm:$0x1]  ;;  %v142_v18 = vrot.slane %v82_v13, 5 }
  0x2c   :  { %vm94_vm5 = vcmp.eq.s32.totalorder %v93_v12, 1  ;;  %s554_s11 = sld [smem:[#allocation5 + $0x7]]  ;;  %s103_s14 = scalar_lea.vmem [#allocation2], %s726_s21 }
  0x2d   :  { %v106_v16 = vstv %s360_s9  ;;  %s557_s12 = sld [smem:[#allocation5 + $0x8]]  ;;  %v95_v19 = vsel %vm94_vm5, %v91_v15, 0.0  ;;  %v104_v20 = vld [vmem:[%s103_s14] sm:$0x1]  ;;  %v161_v24 = vsel %vm160_vm8, %v159_v21, %v142_v18 }
  0x2e   :  { %s559_s13 = sld [smem:[#allocation5 + $0x9]]  ;;  %vm107_vm7 = vcmp.eq.s32.totalorder %v106_v16, 1  ;;  %p111_p9 = scmp.ge.s32.totalorder %s547_s8, 0  ;;  %v145_v23 = vrot.slane %v95_v19, 4 }
  0x2f   :  { %p112_p10 = scmp.lt.s32.totalorder %s547_s8, 16  ;;  %s564_s15 = sld [smem:[#allocation5 + $0xa]]  ;;  %v108_v22 = vsel %vm107_vm7, %v104_v20, 0.0 }
  0x30   :  { %s570_s0 = sld [smem:[#allocation5 + $0xb]]  ;;  %v148_v25 = vrot.slane %v108_v22, 3  ;;  %v163_v28 = vsel %vm162_vm9, %v161_v24, %v145_v23 }
  0x31   :  { %p566_p11 = pnand %p112_p10, %p111_p9  ;;  %s633_s29 = sld [smem:[#allocation5 + $0xc]] }
  0x32   :  { %p124_p12 = scmp.ge.s32.totalorder %s554_s11, 0  ;;  %p125_p13 = scmp.lt.s32.totalorder %s554_s11, 16  ;;  %v165_v31 = vsel %vm164_vm10, %v163_v28, %v148_v25 }
  0x33   :  { %s728_s8 = smov (%p566_p11, %s547_s8), 0  ;;  %p174_p1 = scmp.ge.s32.totalorder %s557_s12, 0 }
  0x34   :  { %s363_s17 = scalar_select %p566_p11, 0, 1 }
  0x35   :  { %p580_p0 = pnand %p125_p13, %p124_p12  ;;  %s116_s19 = scalar_lea.vmem [#allocation2], %s728_s8 }
  0x36   :  { %v117_v26 = vld [vmem:[%s116_s19] sm:$0x1]  ;;  %v119_v27 = vstv %s363_s17  ;;  %p175_p2 = scmp.lt.s32.totalorder %s557_s12, 16  ;;  %p187_p4 = scmp.ge.s32.totalorder %s559_s13, 0 }
  0x37   :  { %vm120_vm11 = vcmp.eq.s32.totalorder %v119_v27, 1  ;;  %s730_s11 = smov (%p580_p0, %s554_s11), 0  ;;  %p188_p5 = scmp.lt.s32.totalorder %s559_s13, 16 }
  0x38   :  { %v121_v29 = vsel %vm120_vm11, %v117_v26, 0.0  ;;  %s366_s20 = scalar_select %p580_p0, 0, 1 }
  0x39   :  { %v151_v30 = vrot.slane %v121_v29, 2  ;;  %p593_p3 = pnand %p175_p2, %p174_p1  ;;  %s129_s1 = scalar_lea.vmem [#allocation2], %s730_s11 }
  0x3a   :  { %v130_v32 = vld [vmem:[%s129_s1] sm:$0x1]  ;;  %v132_v33 = vstv %s366_s20  ;;  %p605_p6 = pnand %p188_p5, %p187_p4  ;;  %p200_p7 = scmp.ge.s32.totalorder %s564_s15, 0 }
  0x3b   :  { %vm133_vm13 = vcmp.eq.s32.totalorder %v132_v33, 1  ;;  %s368_s22 = scalar_select %p593_p3, 0, %s557_s12  ;;  %v167_v35 = vsel %vm166_vm12, %v165_v31, %v151_v30 }
  0x3c   :  { %v134_v34 = vsel %vm133_vm13, %v130_v32, 0.0  ;;  %s369_s23 = scalar_select %p593_p3, 0, 1 }
  0x3d   :  { %v154_v36 = vrot.slane %v134_v34, 1  ;;  %p201_p8 = scmp.lt.s32.totalorder %s564_s15, 16  ;;  %s732_s13 = smov (%p605_p6, %s559_s13), 0 }
  0x3e   :  { %s372_s25 = scalar_select %p605_p6, 0, 1  ;;  %v182_v41 = vstv %s369_s23 }
  0x3f   :  { %v169_v37 = vsel %vm168_vm14, %v167_v35, %v154_v36  ;;  %p618_p9 = pnand %p201_p8, %p200_p7  ;;  %p213_p10 = scmp.ge.s32.totalorder %s570_s0, 0  ;;  %vm183_vm2 = vcmp.eq.s32.totalorder %v182_v41, 1 }
  0x40   :  { %171 = vst.msk [vmem:[#allocation6] sm:$0xff] %vm170_vm15, %v169_v37  ;;  %p214_p11 = scmp.lt.s32.totalorder %s570_s0, 16  ;;  %v195_v38 = vstv %s372_s25  ;;  %s192_s30 = scalar_lea.vmem [#allocation2], %s732_s13 }
  0x41   :  { %s734_s15 = smov (%p618_p9, %s564_s15), 0  ;;  %v193_v39 = vld [vmem:[%s192_s30] sm:$0x1]  ;;  %vm196_vm0 = vcmp.eq.s32.totalorder %v195_v38, 1  ;;  %s640_s4 = sld [smem:[#allocation5 + $0xd]] }
  0x42   :  { %s375_s27 = scalar_select %p618_p9, 0, 1  ;;  %v197_v42 = vsel %vm196_vm0, %v193_v39, 0.0 }
  0x43   :  { %p629_p12 = pnand %p214_p11, %p213_p10  ;;  %s205_s5 = scalar_lea.vmem [#allocation2], %s734_s15  ;;  %v277_v46 = vrot.slane %v197_v42, 7 }
  0x44   :  { %v208_v40 = vstv %s375_s27  ;;  %v206_v43 = vld [vmem:[%s205_s5] sm:$0x1]  ;;  %s642_s6 = sld [smem:[#allocation5 + $0xe]]  ;;  %s179_s7 = scalar_lea.vmem [#allocation2], %s368_s22 }
  0x45   :  { %s736_s0 = smov (%p629_p12, %s570_s0), 0  ;;  %vm209_vm1 = vcmp.eq.s32.totalorder %v208_v40, 1  ;;  %v180_v45 = vld [vmem:[%s179_s7] sm:$0x1]  ;;  %p226_p13 = scmp.ge.s32.totalorder %s633_s29, 0 }
  0x46   :  { %s378_s3 = scalar_select %p629_p12, 0, 1  ;;  %v210_v47 = vsel %vm209_vm1, %v206_v43, 0.0  ;;  %v184_v49 = vsel %vm183_vm2, %v180_v45, 0.0 }
  0x47   :  { %p227_p0 = scmp.lt.s32.totalorder %s633_s29, 16  ;;  %s218_s8 = scalar_lea.vmem [#allocation2], %s736_s0  ;;  %v280_v51 = vrot.slane %v210_v47, 6  ;;  %v297_v52 = vsel %vm156_vm4, %v184_v49, %v277_v46 }
  0x48   :  { %v221_v44 = vstv %s378_s3  ;;  %v219_v48 = vld [vmem:[%s218_s8] sm:$0x1]  ;;  %s650_s9 = sld [smem:[#allocation5 + $0xf]]  ;;  %p239_p2 = scmp.ge.s32.totalorder %s640_s4, 0 }
  0x49   :  { %vm222_vm3 = vcmp.eq.s32.totalorder %v221_v44, 1  ;;  %p228_p1 = pnand %p227_p0, %p226_p13  ;;  %p240_p3 = scmp.lt.s32.totalorder %s640_s4, 16  ;;  %v298_v57 = vsel %vm158_vm6, %v297_v52, %v280_v51 }
  0x4a   :  { %v223_v50 = vsel %vm222_vm3, %v219_v48, 0.0  ;;  %p252_p5 = scmp.ge.s32.totalorder %s642_s6, 0  ;;  %p253_p6 = scmp.lt.s32.totalorder %s642_s6, 16 }
  0x4b   :  { %s738_s29 = smov (%p228_p1, %s633_s29), 0  ;;  %p655_p4 = pnand %p240_p3, %p239_p2  ;;  %v283_v55 = vrot.slane %v223_v50, 5 }
  0x4c   :  { %s381_s10 = scalar_select %p228_p1, 0, 1 }
  0x4d   :  { %s231_s12 = scalar_lea.vmem [#allocation2], %s738_s29  ;;  %s740_s4 = smov (%p655_p4, %s640_s4), 0  ;;  %v299_v61 = vsel %vm160_vm8, %v298_v57, %v283_v55 }
  0x4e   :  { %v232_v53 = vld [vmem:[%s231_s12] sm:$0x1]  ;;  %v234_v54 = vstv %s381_s10  ;;  %s384_s13 = scalar_select %p655_p4, 0, 1 }
  0x4f   :  { %vm235_vm5 = vcmp.eq.s32.totalorder %v234_v54, 1  ;;  %p668_p7 = pnand %p253_p6, %p252_p5  ;;  %s244_s15 = scalar_lea.vmem [#allocation2], %s740_s4 }
  0x50   :  { %v236_v56 = vsel %vm235_vm5, %v232_v53, 0.0  ;;  %v245_v58 = vld [vmem:[%s244_s15] sm:$0x1]  ;;  %v247_v59 = vstv %s384_s13  ;;  %p265_p8 = scmp.ge.s32.totalorder %s650_s9, 0  ;;  %p266_p9 = scmp.lt.s32.totalorder %s650_s9, 16 }
  0x51   :  { %v286_v60 = vrot.slane %v236_v56, 4  ;;  %vm248_vm4 = vcmp.eq.s32.totalorder %v247_v59, 1  ;;  %s742_s6 = smov (%p668_p7, %s642_s6), 0  ;;  %s453_s20 = smov [#allocation6]  }
  0x52   :  { %v249_v62 = vsel %vm248_vm4, %v245_v58, 0.0  ;;  %s387_s16 = scalar_select %p668_p7, 0, 1 }
  0x53   :  { %p680_p10 = pnand %p266_p9, %p265_p8  ;;  %v289_v63 = vrot.slane %v249_v62, 3  ;;  %s257_s17 = scalar_lea.vmem [#allocation2], %s742_s6  ;;  %v300_v2 = vsel %vm162_vm9, %v299_v61, %v286_v60 }
  0x54   :  { %v258_v0 = vld [vmem:[%s257_s17] sm:$0x1]  ;;  %v260_v1 = vstv %s387_s16  ;;  %s311_s21 = sshll.u32 %s453_s20, 4  ;;  %s312_s21 = int_to_ptr.vmem [resolvable:$true] %s311_s21 }
  0x55   :  { %vm261_vm6 = vcmp.eq.s32.totalorder %v260_v1, 1  ;;  %s744_s9 = smov (%p680_p10, %s650_s9), 0  ;;  %v301_v5 = vsel %vm164_vm10, %v300_v2, %v289_v63  ;;  %s425_s1 = scalar_lea.vmem %s312_s21, 256 }
  0x56   :  { %v262_v3 = vsel %vm261_vm6, %v258_v0, 0.0  ;;  %s390_s18 = scalar_select %p680_p10, 0, 1 }
  0x57   :  { %v292_v4 = vrot.slane %v262_v3, 2  ;;  %s270_s19 = scalar_lea.vmem [#allocation2], %s744_s9  ;;  %p426_p11 = scmp.ne.s32.totalorder %s312_s21, %s425_s1 }
  0x58   :  { %v271_v6 = vld [vmem:[%s270_s19] sm:$0x1]  ;;  %v273_v7 = vstv %s390_s18  ;;  %p430_p12 = scmp.lt.s32.totalorder %s312_s21, %s312_s21  ;;  %p431_p13 = scmp.lt.s32.totalorder %s425_s1, %s425_s1 }
  0x59   :  { %vm274_vm7 = vcmp.eq.s32.totalorder %v273_v7, 1  ;;  %v302_v9 = vsel %vm166_vm12, %v301_v5, %v292_v4 }
  0x5a   :  { %v275_v8 = vsel %vm274_vm7, %v271_v6, 0.0  ;;  %p432_p0 = por %p431_p13, %p430_p12 }
  0x5b   :  { %v295_v10 = vrot.slane %v275_v8, 1 }
  0x5c   :  { %p433_p1 = pnand %p432_p0, %p426_p11 }
  0x5d   :  { %v303_v11 = vsel %vm168_vm14, %v302_v9, %v295_v10 }
  0x5e   :  { %305 = vst.msk [vmem:[#allocation6 + $0x8] sm:$0xff] %vm170_vm15, %v303_v11 }
  0x5f   :  { %436 = shalt.err (!%p433_p1)
}
  0x60   :  { %s454_s22 = smov 128   ;;  %s455_s23 = smov 8  }
  0x61   :  { %317 = dma.vmem_to_hbm [thread:$0]  %s312_s21, 256, %s699_s2, [#allocation7], %s454_s22, %s454_s22, %s455_s23  }
  0x62   :  { %449 = dma.done.wait [#allocation7], 256  }
  0x63   :  { %450 = vsyncadd [#allocation7], 4294967040 }
  0x64   :  { %321 = vsyncpa [#allocation7], 1 }
  0x65   :  { %322 = vsyncmov [#allocation3] }
  0x68   :  { %s323_s26 = vpop.sfrf %322 }
  0x69   :  { %p391_p2 = scmp.ne.s32.totalorder %s323_s26, 0 }
  0x6b   :  { %327 = shalt.err (%p391_p2)  }

</bundles_post_ra>
